<compile_context>
chip_gen: v5e
topology: v5e:2x2
jax: 0.10.0
libtpu: 0.0.40
codegen_flags: <defaults>
</compile_context>

<pallas_src>
import jax
import jax.numpy as jnp
from jax import lax
from jax.experimental import pallas as pl
from jax.experimental.pallas import tpu as pltpu


def _round_up(x, m):
    return ((x + m - 1) // m) * m


# --------------------- Conv1d (stride=1, 'same' pad) + MaxPool ---------------------
def make_conv_kernel(K, Lout, Cin, Cin_pad):
    def kernel(x_ref, w_ref, b_ref, o_ref, p_scr):
        # x_ref: (1, Lpad, Cin)   w_ref: (K*Cin_pad, Cout) bf16   b_ref: (1, Cout)
        # o_ref: (1, Lout, Cout)  p_scr: VMEM (Lout, K*Cin_pad) im2col patches.
        if Cin != Cin_pad:
            p_scr[...] = jnp.zeros_like(p_scr)     # zero padding lanes once
        for k in range(K):                          # static unroll over taps
            p_scr[:, k * Cin_pad:k * Cin_pad + Cin] = x_ref[0, k:k + Lout, :]
        o_ref[0] = (jnp.dot(p_scr[...].astype(jnp.bfloat16), w_ref[...],
                            preferred_element_type=jnp.float32) + b_ref[...])
    return kernel


def make_pool_kernel(p):
    def kernel(x_ref, o_ref):
        # x_ref: (B, p, Lp, C) with the pool window on an untiled leading axis.
        m = x_ref[:, 0]
        for j in range(1, p):
            m = jnp.maximum(m, x_ref[:, j])
        o_ref[...] = m
    return kernel


def conv1d_maxpool(x_blc, blk):
    # x_blc: (B, L, Cin) time-major.  Conv1d(stride=1, padding=K//2) + MaxPool1d(pool).
    B, L, Cin = x_blc.shape
    K, cin_pad, pool = blk["K"], blk["cin_pad"], blk["pool"]
    Cout = blk["conv_b"].shape[1]
    pad = K // 2
    Lout = L + 2 * pad - K + 1
    Lpad = L + 2 * pad
    xp = jnp.pad(x_blc, ((0, 0), (pad, pad), (0, 0)))
    conv = pl.pallas_call(
        make_conv_kernel(K, Lout, Cin, cin_pad),
        grid=(B,),
        in_specs=[
            pl.BlockSpec((1, Lpad, Cin), lambda i: (i, 0, 0)),
            pl.BlockSpec((K * cin_pad, Cout), lambda i: (0, 0)),
            pl.BlockSpec((1, Cout), lambda i: (0, 0)),
        ],
        out_specs=pl.BlockSpec((1, Lout, Cout), lambda i: (i, 0, 0)),
        out_shape=jax.ShapeDtypeStruct((B, Lout, Cout), jnp.float32),
        scratch_shapes=[pltpu.VMEM((Lout, K * cin_pad), jnp.float32)],
        compiler_params=pltpu.CompilerParams(
            dimension_semantics=("parallel",)),
    )(xp, blk["conv_w2"], blk["conv_b"])
    # MaxPool1d: free reshape puts the window on an untiled leading axis.
    Lp = Lout // pool
    xr = conv[:, :Lp * pool, :].reshape(B, Lp, pool, Cout).transpose(0, 2, 1, 3)
    return pl.pallas_call(
        make_pool_kernel(pool),
        out_shape=jax.ShapeDtypeStruct((B, Lp, Cout), jnp.float32),
    )(xr)


# --------------------------- big matmul + bias (shared) ----------------------------
def matmul_bias_kernel(x_ref, w_ref, b_ref, o_ref):
    o_ref[...] = (jnp.dot(x_ref[...].astype(jnp.bfloat16), w_ref[...],
                          preferred_element_type=jnp.float32) + b_ref[...])


def matmul_bias(x2d, w_bf16, b, row_block=512):
    # One large (N, Din) @ (Din, G) matmul; used for the hoisted GRU input-gate
    # projection (both directions at once) and the classifier.
    N, Din = x2d.shape
    G = w_bf16.shape[1]
    if N % row_block != 0:
        row_block = N
    return pl.pallas_call(
        matmul_bias_kernel,
        grid=(N // row_block,),
        in_specs=[
            pl.BlockSpec((row_block, Din), lambda i: (i, 0)),
            pl.BlockSpec((Din, G), lambda i: (0, 0)),
            pl.BlockSpec((1, G), lambda i: (0, 0)),
        ],
        out_specs=pl.BlockSpec((row_block, G), lambda i: (i, 0)),
        out_shape=jax.ShapeDtypeStruct((N, G), jnp.float32),
        compiler_params=pltpu.CompilerParams(
            dimension_semantics=("parallel",)),
    )(x2d, w_bf16, b)


# --------------- fused bidirectional GRU recurrence (one layer) --------------------
def gru_bidir_kernel(gi_ref, h0_ref, whh_ref, bhh_ref, out_ref, hT_ref, h_scr):
    # gi_ref : (L, B, 6*Hp) precomputed x@W_ih + b_ih.
    #          lanes [0:3Hp]   = forward  gates (r|z|n, each Hp wide, 128-aligned)
    #          lanes [3Hp:6Hp] = backward gates
    # h0_ref : (2, B, Hp)          whh_ref: (2, Hp, 3*Hp) bf16
    # bhh_ref: (2, 1, 3*Hp)        out_ref: (L, B, 2*Hp)    hT_ref: (2, B, Hp)
    # h_scr  : VMEM (2, B, Hp) running hidden state (fwd, bwd).
    L = gi_ref.shape[0]
    Hp = h0_ref.shape[2]
    G = 3 * Hp
    h_scr[...] = h0_ref[...]

    # Static-slice ref views (zero cost) -> all per-step accesses are 128-aligned.
    gi_fv = gi_ref.at[:, :, 0:G]
    gi_bv = gi_ref.at[:, :, G:2 * G]
    out_fv = out_ref.at[:, :, 0:Hp]
    out_bv = out_ref.at[:, :, Hp:2 * Hp]

    def gate_update(gi, gh, h):
        r = jax.nn.sigmoid(gi[:, 0:Hp] + gh[:, 0:Hp])
        z = jax.nn.sigmoid(gi[:, Hp:2 * Hp] + gh[:, Hp:2 * Hp])
        n = jnp.tanh(gi[:, 2 * Hp:G] + r * gh[:, 2 * Hp:G])
        return (1.0 - z) * n + z * h

    def step(t, carry):
        tb = L - 1 - t                      # backward stream time index
        h_f = h_scr[0]
        h_b = h_scr[1]
        gi_f = gi_fv[t]                     # (B, 3Hp)
        gi_b = gi_bv[tb]
        gh_f = jnp.dot(h_f.astype(jnp.bfloat16), whh_ref[0],
                       preferred_element_type=jnp.float32) + bhh_ref[0]
        gh_b = jnp.dot(h_b.astype(jnp.bfloat16), whh_ref[1],
                       preferred_element_type=jnp.float32) + bhh_ref[1]
        hf_new = gate_update(gi_f, gh_f, h_f)
        hb_new = gate_update(gi_b, gh_b, h_b)
        h_scr[0] = hf_new
        h_scr[1] = hb_new
        out_fv[t] = hf_new                  # lane-dense 128-wide stores
        out_bv[tb] = hb_new
        return carry

    lax.fori_loop(0, L, step, 0, unroll=2)
    hT_ref[...] = h_scr[...]


def gru_bidir_layer(gi, h0_pair, whh_pair, bhh_pair):
    # TODO(synk): for very long sequences add a time-chunked ("arbitrary") grid with
    # the hidden state carried in scratch so VMEM stays bounded on v7x (64 MiB).
    L, B, _ = gi.shape
    Hp = h0_pair.shape[2]
    return pl.pallas_call(
        gru_bidir_kernel,
        out_shape=(jax.ShapeDtypeStruct((L, B, 2 * Hp), jnp.float32),
                   jax.ShapeDtypeStruct((2, B, Hp), jnp.float32)),
        scratch_shapes=[pltpu.VMEM((2, B, Hp), jnp.float32)],
        compiler_params=pltpu.CompilerParams(
            vmem_limit_bytes=64 * 1024 * 1024),
    )(gi, h0_pair, whh_pair, bhh_pair)


# ------------------ ConvTranspose1d with kernel_size == stride ---------------------
def convtranspose1d_kernel(x_ref, w_ref, b_ref, o_ref):
    # x_ref: (1, Lin, Cin)  w_ref: (Cin, S*Cout) bf16 (column k*Cout+co == tap k)
    # b_ref: (1, S*Cout)    o_ref: (1, Lin, S*Cout)
    o_ref[0] = (jnp.dot(x_ref[0].astype(jnp.bfloat16), w_ref[...],
                        preferred_element_type=jnp.float32) + b_ref[...])


def convtranspose1d(x_blc, up):
    B, Lin, Cin = x_blc.shape
    S, Cout = up["s"], up["cout"]
    y = pl.pallas_call(
        convtranspose1d_kernel,
        grid=(B,),
        in_specs=[
            pl.BlockSpec((1, Lin, Cin), lambda i: (i, 0, 0)),
            pl.BlockSpec((Cin, S * Cout), lambda i: (0, 0)),
            pl.BlockSpec((1, S * Cout), lambda i: (0, 0)),
        ],
        out_specs=pl.BlockSpec((1, Lin, S * Cout), lambda i: (i, 0, 0)),
        out_shape=jax.ShapeDtypeStruct((B, Lin, S * Cout), jnp.float32),
        compiler_params=pltpu.CompilerParams(
            dimension_semantics=("parallel",)),
    )(x_blc, up["wc"], up["bt"])
    # (B, Lin, S*Cout) -> (B, Lin*S, Cout) is a free reshape in time-major layout.
    return y.reshape(B, Lin * S, Cout)


# --------------------------------- RCNN forward -------------------------------------
def rcnn_forward(params, x):
    # x: (B, Cin, L) float32, PyTorch NCL layout.
    # TODO(synk): nn.Dropout at the input is identity in eval mode (no RNG here).
    B = x.shape[0]
    H, Hp = params["hidden"], params["hp"]
    x_blc = jnp.transpose(x, (0, 2, 1))                        # (B, L, Cin) time-major
    h = jnp.zeros((4, B, Hp), jnp.float32)                     # (layer*2+dir, B, Hp)
    for blk in params["blocks"]:
        sx = conv1d_maxpool(x_blc, blk)                        # (B, Lp, H)
        Lp = sx.shape[1]
        x_tb = jnp.transpose(sx, (1, 0, 2))                    # (Lp, B, H)
        # ---- GRU layer 0 (fwd + bwd fused; gi hoisted into one big matmul) ----
        gi0 = matmul_bias(x_tb.reshape(Lp * B, H), blk["wih0"], blk["bih0"])
        out0, hT0 = gru_bidir_layer(gi0.reshape(Lp, B, 6 * Hp), h[0:2],
                                    blk["whh0"], blk["bhh0"])
        # ---- GRU layer 1 ----
        gi1 = matmul_bias(out0.reshape(Lp * B, 2 * Hp), blk["wih1"], blk["bih1"])
        out1, hT1 = gru_bidir_layer(gi1.reshape(Lp, B, 6 * Hp), h[2:4],
                                    blk["whh1"], blk["bhh1"])
        h = jnp.concatenate([hT0, hT1], axis=0)                # (4, B, Hp)
        tx = jnp.transpose(out1, (1, 0, 2))                    # (B, Lp, 2Hp)
        # channel order matches torch.cat([tx.transpose(-1,-2), sx], dim=-2):
        # [gru fwd (H), gru bwd (H), conv/pool features (H)]
        x_blc = jnp.concatenate([tx[..., 0:H], tx[..., Hp:Hp + H], sx], axis=-1)
    for up in params["up"]:
        x_blc = convtranspose1d(x_blc, up)                     # (B, L*s, H)
    Bf, Lf, Hc = x_blc.shape
    y = matmul_bias(x_blc.reshape(Bf * Lf, Hc), params["cls_w"], params["cls_b"])
    y = y[:, 0:params["num_classes"]].reshape(Bf, Lf, params["num_classes"])
    # Note: the reference PyTorch forward does NOT apply self.output_act (softmax).
    return y


# ---------------------------------- Param init --------------------------------------
def init_params(key, in_channels, hidden, num_classes=2, kernel_size=5,
                scale_factor=2, output_scale_factor=3, num_blocks=3):
    keys = iter(jax.random.split(key, 256))
    H = hidden
    Hp = _round_up(H, 128)

    def u(shape, fan_in):
        bound = 1.0 / float(fan_in) ** 0.5
        return jax.random.uniform(next(keys), shape, jnp.float32, -bound, bound)

    def pad_gate_cols(m):
        # (..., 3H) -> (..., 3Hp): each r|z|n block lands at a 128-aligned offset.
        parts = []
        for g in range(3):
            blk = m[..., g * H:(g + 1) * H]
            pad = [(0, 0)] * (m.ndim - 1) + [(0, Hp - H)]
            parts.append(jnp.pad(blk, pad))
        return jnp.concatenate(parts, axis=-1)

    def pack_layer(din_logical, padded_input):
        wihs, bihs, whhs, bhhs = [], [], [], []
        for _direction in range(2):
            wih = u((din_logical, 3 * H), H)     # W_ih^T, PyTorch gate order r|z|n
            whh = u((H, 3 * H), H)               # W_hh^T
            bih = u((3 * H,), H)
            bhh = u((3 * H,), H)
            wih_p = pad_gate_cols(wih)           # (Din, 3Hp)
            if padded_input:
                # layer-1 input features live at lanes [0:H] (fwd) and [Hp:Hp+H] (bwd)
                top = jnp.pad(wih_p[0:H], ((0, Hp - H), (0, 0)))
                bot = jnp.pad(wih_p[H:2 * H], ((0, Hp - H), (0, 0)))
                wih_p = jnp.concatenate([top, bot], axis=0)          # (2Hp, 3Hp)
            whh_p = jnp.pad(pad_gate_cols(whh), ((0, Hp - H), (0, 0)))  # (Hp, 3Hp)
            wihs.append(wih_p)
            bihs.append(pad_gate_cols(bih.reshape(1, 3 * H)))
            whhs.append(whh_p)
            bhhs.append(pad_gate_cols(bhh.reshape(1, 3 * H)))
        wih_cat = jnp.concatenate(wihs, axis=1).astype(jnp.bfloat16)  # (Din_p, 6Hp)
        bih_cat = jnp.concatenate(bihs, axis=1)                       # (1, 6Hp)
        whh_stack = jnp.stack(whhs, axis=0).astype(jnp.bfloat16)      # (2, Hp, 3Hp)
        bhh_stack = jnp.stack(bhhs, axis=0)                           # (2, 1, 3Hp)
        return wih_cat, bih_cat, whh_stack, bhh_stack

    blocks = []
    cin = in_channels
    K = kernel_size
    for i in range(num_blocks):
        pool = output_scale_factor if i + 1 == num_blocks else scale_factor
        conv_w = u((H, cin, K), cin * K)        # PyTorch Conv1d layout (Cout, Cin, K)
        conv_b = u((H,), cin * K)
        cin_pad = _round_up(cin, 128)
        wt = jnp.transpose(conv_w, (2, 1, 0))                         # (K, Cin, Cout)
        wt = jnp.pad(wt, ((0, 0), (0, cin_pad - cin), (0, 0)))
        conv_w2 = wt.reshape(K * cin_pad, H).astype(jnp.bfloat16)     # im2col weights
        wih0, bih0, whh0, bhh0 = pack_layer(H, padded_input=False)
        wih1, bih1, whh1, bhh1 = pack_layer(2 * H, padded_input=True)
        blocks.append(dict(conv_w2=conv_w2, conv_b=conv_b.reshape(1, H),
                           K=K, cin=cin, cin_pad=cin_pad, pool=pool,
                           wih0=wih0, bih0=bih0, whh0=whh0, bhh0=bhh0,
                           wih1=wih1, bih1=bih1, whh1=whh1, bhh1=bhh1))
        cin = H * 3

    ups = []
    up_specs = [(cin, H, output_scale_factor),
                (H, H, scale_factor * (num_blocks - 1))]
    for (ci, co, s) in up_specs:
        w = u((ci, co, s), ci * s)              # PyTorch ConvTranspose1d (Cin, Cout, K)
        b = u((co,), ci * s)
        wc = jnp.transpose(w, (0, 2, 1)).reshape(ci, s * co).astype(jnp.bfloat16)
        bt = jnp.tile(b, s).reshape(1, s * co)
        ups.append(dict(wc=wc, bt=bt, s=s, cout=co))

    cpad = _round_up(num_classes, 128)
    cls_w = u((H, num_classes), H)
    cls_b = u((num_classes,), H)
    cls_w_pad = jnp.pad(cls_w, ((0, 0), (0, cpad - num_classes))).astype(jnp.bfloat16)
    cls_b_pad = jnp.pad(cls_b, (0, cpad - num_classes)).reshape(1, cpad)

    return dict(blocks=blocks, up=ups, cls_w=cls_w_pad, cls_b=cls_b_pad,
                hidden=H, hp=Hp, num_classes=num_classes)


if __name__ == "__main__":
    key = jax.random.PRNGKey(0)
    kp, kx = jax.random.split(key)

    B, Cin, L, hidden, num_classes = 2, 4, 24, 8, 2
    params = init_params(kp, Cin, hidden, num_classes=num_classes)
    x = jax.random.normal(kx, (B, Cin, L), jnp.float32)

    y = rcnn_forward(params, x)
    y = jax.block_until_ready(y)
    assert y.shape == (B, L, num_classes), y.shape
    assert bool(jnp.all(jnp.isfinite(y)))
    print("KERNEL_OK")
</pallas_src>

<mosaic_0001>
module attributes {stable_mosaic.version = 11 : i64} {
  func.func @kernel(%arg0: i32, %arg1: memref<1x28x4xf32, #tpu.memory_space<vmem>>, %arg2: memref<640x8xbf16, #tpu.memory_space<vmem>>, %arg3: memref<1x8xf32, #tpu.memory_space<vmem>>, %arg4: memref<1x24x8xf32, #tpu.memory_space<vmem>>, %arg5: memref<24x640xf32, #tpu.memory_space<vmem>>) attributes {dimension_semantics = [#tpu.dimension_semantics<parallel>], iteration_bounds = array<i64: 2>, scalar_prefetch = 0 : i64, scratch_operands = 1 : i64, tpu.core_type = #tpu.core_type<tc>, window_params = [{transform_indices = @transform_0, window_bounds = array<i64: 1, 28, 4>}, {pipeline_mode = #tpu.pipeline_mode<synchronous>, transform_indices = @transform_1, window_bounds = array<i64: 640, 8>}, {pipeline_mode = #tpu.pipeline_mode<synchronous>, transform_indices = @transform_2, window_bounds = array<i64: 1, 8>}, {transform_indices = @transform_3, window_bounds = array<i64: 1, 24, 8>}]} {
    %cst = arith.constant 0.000000e+00 : f32
    %0 = vector.broadcast %cst : f32 to vector<24x640xf32>
    %c0 = arith.constant 0 : index
    %c0_0 = arith.constant 0 : index
    %1 = vector.load %arg5[%c0, %c0_0] : memref<24x640xf32, #tpu.memory_space<vmem>>, vector<24x640xf32>
    tpu.vector_store %arg5[%c0, %c0_0], %0 {strides = array<i32>} : memref<24x640xf32, #tpu.memory_space<vmem>>, vector<24x640xf32>,
    %c0_1 = arith.constant 0 : index
    %c0_2 = arith.constant 0 : index
    %c0_3 = arith.constant 0 : index
    %2 = vector.load %arg1[%c0_1, %c0_2, %c0_3] : memref<1x28x4xf32, #tpu.memory_space<vmem>>, vector<1x24x4xf32>
    %3 = vector.shape_cast %2 : vector<1x24x4xf32> to vector<24x4xf32>
    %c0_4 = arith.constant 0 : index
    %c0_5 = arith.constant 0 : index
    %4 = vector.load %arg5[%c0_4, %c0_5] : memref<24x640xf32, #tpu.memory_space<vmem>>, vector<24x4xf32>
    tpu.vector_store %arg5[%c0_4, %c0_5], %3 {strides = array<i32>} : memref<24x640xf32, #tpu.memory_space<vmem>>, vector<24x4xf32>,
    %c0_6 = arith.constant 0 : index
    %c1 = arith.constant 1 : index
    %c0_7 = arith.constant 0 : index
    %5 = vector.load %arg1[%c0_6, %c1, %c0_7] : memref<1x28x4xf32, #tpu.memory_space<vmem>>, vector<1x24x4xf32>
    %6 = vector.shape_cast %5 : vector<1x24x4xf32> to vector<24x4xf32>
    %c0_8 = arith.constant 0 : index
    %c128 = arith.constant 128 : index
    %7 = vector.load %arg5[%c0_8, %c128] : memref<24x640xf32, #tpu.memory_space<vmem>>, vector<24x4xf32>
    tpu.vector_store %arg5[%c0_8, %c128], %6 {strides = array<i32>} : memref<24x640xf32, #tpu.memory_space<vmem>>, vector<24x4xf32>,
    %c0_9 = arith.constant 0 : index
    %c2 = arith.constant 2 : index
    %c0_10 = arith.constant 0 : index
    %8 = vector.load %arg1[%c0_9, %c2, %c0_10] : memref<1x28x4xf32, #tpu.memory_space<vmem>>, vector<1x24x4xf32>
    %9 = vector.shape_cast %8 : vector<1x24x4xf32> to vector<24x4xf32>
    %c0_11 = arith.constant 0 : index
    %c256 = arith.constant 256 : index
    %10 = vector.load %arg5[%c0_11, %c256] : memref<24x640xf32, #tpu.memory_space<vmem>>, vector<24x4xf32>
    tpu.vector_store %arg5[%c0_11, %c256], %9 {strides = array<i32>} : memref<24x640xf32, #tpu.memory_space<vmem>>, vector<24x4xf32>,
    %c0_12 = arith.constant 0 : index
    %c3 = arith.constant 3 : index
    %c0_13 = arith.constant 0 : index
    %11 = vector.load %arg1[%c0_12, %c3, %c0_13] : memref<1x28x4xf32, #tpu.memory_space<vmem>>, vector<1x24x4xf32>
    %12 = vector.shape_cast %11 : vector<1x24x4xf32> to vector<24x4xf32>
    %c0_14 = arith.constant 0 : index
    %c384 = arith.constant 384 : index
    %13 = vector.load %arg5[%c0_14, %c384] : memref<24x640xf32, #tpu.memory_space<vmem>>, vector<24x4xf32>
    tpu.vector_store %arg5[%c0_14, %c384], %12 {strides = array<i32>} : memref<24x640xf32, #tpu.memory_space<vmem>>, vector<24x4xf32>,
    %c0_15 = arith.constant 0 : index
    %c4 = arith.constant 4 : index
    %c0_16 = arith.constant 0 : index
    %14 = vector.load %arg1[%c0_15, %c4, %c0_16] : memref<1x28x4xf32, #tpu.memory_space<vmem>>, vector<1x24x4xf32>
    %15 = vector.shape_cast %14 : vector<1x24x4xf32> to vector<24x4xf32>
    %c0_17 = arith.constant 0 : index
    %c512 = arith.constant 512 : index
    %16 = vector.load %arg5[%c0_17, %c512] : memref<24x640xf32, #tpu.memory_space<vmem>>, vector<24x4xf32>
    tpu.vector_store %arg5[%c0_17, %c512], %15 {strides = array<i32>} : memref<24x640xf32, #tpu.memory_space<vmem>>, vector<24x4xf32>,
    %c0_18 = arith.constant 0 : index
    %c0_19 = arith.constant 0 : index
    %17 = vector.load %arg5[%c0_18, %c0_19] : memref<24x640xf32, #tpu.memory_space<vmem>>, vector<24x640xf32>
    %18 = arith.truncf %17 : vector<24x640xf32> to vector<24x640xbf16>
    %c0_20 = arith.constant 0 : index
    %c0_21 = arith.constant 0 : index
    %19 = vector.load %arg2[%c0_20, %c0_21] : memref<640x8xbf16, #tpu.memory_space<vmem>>, vector<640x8xbf16>
    %cst_22 = arith.constant dense<0.000000e+00> : vector<24x8xf32>
    %20 = tpu.matmul %18, %19, %cst_22 {dimension_numbers = #tpu.dot_dimension_numbers<[1], [0], [0], [1], [0, 0, 1, 1], [], []>} : vector<24x640xbf16>, vector<640x8xbf16>, vector<24x8xf32> -> vector<24x8xf32>
    %c0_23 = arith.constant 0 : index
    %c0_24 = arith.constant 0 : index
    %21 = vector.load %arg3[%c0_23, %c0_24] : memref<1x8xf32, #tpu.memory_space<vmem>>, vector<1x8xf32>
    %22 = vector.broadcast %21 : vector<1x8xf32> to vector<24x8xf32>
    %23 = arith.addf %20, %22 : vector<24x8xf32>
    %c0_25 = arith.constant 0 : index
    %c0_26 = arith.constant 0 : index
    %c0_27 = arith.constant 0 : index
    %24 = vector.load %arg4[%c0_25, %c0_26, %c0_27] : memref<1x24x8xf32, #tpu.memory_space<vmem>>, vector<1x24x8xf32>
    %25 = vector.shape_cast %24 : vector<1x24x8xf32> to vector<24x8xf32>
    %26 = vector.shape_cast %23 : vector<24x8xf32> to vector<1x24x8xf32>
    tpu.vector_store %arg4[%c0_25, %c0_26, %c0_27], %26 {strides = array<i32>} : memref<1x24x8xf32, #tpu.memory_space<vmem>>, vector<1x24x8xf32>,
    return
  }
  func.func @transform_0(%arg0: i32) -> (i32, i32, i32) {
    %c0_i32 = arith.constant 0 : i32
    %c0_i32_0 = arith.constant 0 : i32
    %c0_i32_1 = arith.constant 0 : i32
    return %arg0, %c0_i32, %c0_i32_0 : i32, i32, i32
  }
  func.func @transform_1(%arg0: i32) -> (i32, i32) {
    %c0_i32 = arith.constant 0 : i32
    %c0_i32_0 = arith.constant 0 : i32
    %c0_i32_1 = arith.constant 0 : i32
    return %c0_i32, %c0_i32_0 : i32, i32
  }
  func.func @transform_2(%arg0: i32) -> (i32, i32) {
    %c0_i32 = arith.constant 0 : i32
    %c0_i32_0 = arith.constant 0 : i32
    %c0_i32_1 = arith.constant 0 : i32
    return %c0_i32, %c0_i32_0 : i32, i32
  }
  func.func @transform_3(%arg0: i32) -> (i32, i32, i32) {
    %c0_i32 = arith.constant 0 : i32
    %c0_i32_0 = arith.constant 0 : i32
    %c0_i32_1 = arith.constant 0 : i32
    return %arg0, %c0_i32, %c0_i32_0 : i32, i32, i32
  }
}

</mosaic_0001>

<bundles_post_ra>
// kernel: tpu_custom_call.1
= control target key start
LH: loop header
LB: loop body
LE: loop exit
PB: predicated region body
PF: predicated region fallthrough
CT: control target
= control target key end

     0   :  { %s974_s12 = smov 0   ;;  %s1150_s0 = inlined_call_operand.vmem [shape: f32[2,28,4], index: 0, kind: input, shape index: {}]   ;;  %s1151_s1 = inlined_call_operand.vmem [shape: bf16[640,8], index: 1, kind: input, shape index: {}]   ;;  %s1152_s2 = inlined_call_operand.vmem [shape: f32[1,8], index: 2, kind: input, shape index: {}]   ;;  %s1153_s3 = inlined_call_operand.vmem [shape: f32[2,24,8], index: 3, kind: output, shape index: {}]  }
   0x1 LB: > { %s715_s13 = sadd.s32 4294967295, %s951_s12   ;;  %p719_p0 = scmp.ge.s32.totalorder %s951_s12, 1  ;;  %s951_s12 = sphi %s974_s12, %s13_s12  }
   0x2   : > { %p137_p1 = scmp.lt.s32.totalorder %s951_s12, 3 }
   0x4   : > { %p138_p2 = pnand %p719_p0, %p137_p1 }
   0x5   : > { %p161_p3 = scmp.lt.s32.totalorder (!%p138_p2), %s715_s13, 1 }
   0x6   : > { %141 = sbr.rel (%p138_p2) target bundleno = 212 (0xd4), region = 32 }
   0xb   : > { %v893_v0 = vld [vmem:[%s1151_s1 + $0x38] sm:$0xff]  ;;  %v953_v4 = vmov 0.0   ;;  %v892_v5 = vld [vmem:[%s1151_s1 + $0x30] sm:$0xff]  ;;  %s1155_s13 = smov (!%p161_p3, %s715_s13), 1  ;;  %v891_v9 = vld [vmem:[%s1151_s1 + $0x28] sm:$0xff]  ;;  %vm189_vm0 = vcmask 31744  }
   0xc   : > { %v901_v1 = vld [vmem:[%s1151_s1 + $0x78] sm:$0xff]  ;;  %171 = vst [vmem:[#allocation2] sm:$0xff] %v953_v4  ;;  %566 = vmatpush.bf16.msra.mxu0 %v893_v0  ;;  %v900_v6 = vld [vmem:[%s1151_s1 + $0x70] sm:$0xff]  ;;  %s885_s30 = sshll.u32 %s1155_s13, 5  ;;  %v899_v10 = vld [vmem:[%s1151_s1 + $0x68] sm:$0xff]  ;;  %s934_s26 = smul.u32 24, %s1155_s13 }
   0xd   : > { %v909_v2 = vld [vmem:[%s1151_s1 + $0xb8] sm:$0xff]  ;;  %584 = vmatpush.bf16.msra.mxu1 %v901_v1  ;;  %176 = vst [vmem:[#allocation2 + $0x28] sm:$0xff] %v953_v4  ;;  %v908_v7 = vld [vmem:[%s1151_s1 + $0xb0] sm:$0xff]  ;;  %v907_v11 = vld [vmem:[%s1151_s1 + $0xa8] sm:$0xff]  ;;  %s1024_s16 = scalar_lea.vmem %s1150_s0, %s885_s30  ;;  %vm656_vm1 = vcmask 64512  }
   0xe   : > { %v917_v3 = vld [vmem:[%s1151_s1 + $0xf8] sm:$0xff]  ;;  %602 = vmatpush.bf16.msra.mxu2 %v909_v2  ;;  %v916_v8 = vld [vmem:[%s1151_s1 + $0xf0] sm:$0xff]  ;;  %172 = vst [vmem:[#allocation2 + $0x8] sm:$0xff] %v953_v4  ;;  %v915_v12 = vld [vmem:[%s1151_s1 + $0xe8] sm:$0xff]  ;;  %s170_s29 = scalar_lea.vmem %s1153_s3, %s934_s26 }
   0xf   : > { %620 = vmatpush.bf16.msra.mxu3 %v917_v3  ;;  %173 = vst [vmem:[#allocation2 + $0x10] sm:$0xff] %v953_v4  ;;  %v890_v13 = vld [vmem:[%s1151_s1 + $0x20] sm:$0xff]  ;;  %v187_v18 = vld [vmem:[%s1024_s16 + $0x8] sm:$0xff]  ;;  %v889_v19 = vld [vmem:[%s1151_s1 + $0x18] sm:$0xff] }
  0x10   : > { %174 = vst [vmem:[#allocation2 + $0x18] sm:$0xff] %v953_v4  ;;  %567 = vmatpush.bf16.msra.mxu0 %v892_v5  ;;  %v898_v14 = vld [vmem:[%s1151_s1 + $0x60] sm:$0xff]  ;;  %v897_v20 = vld [vmem:[%s1151_s1 + $0x58] sm:$0xff]  ;;  %v194_v24 = vld [vmem:[%s1024_s16 + $0x9] sm:$0xff] }
  0x11   : > { %585 = vmatpush.bf16.msra.mxu1 %v900_v6  ;;  %175 = vst [vmem:[#allocation2 + $0x20] sm:$0xff] %v953_v4  ;;  %v186_v15 = vld [vmem:[%s1024_s16] sm:$0xff]  ;;  %v905_v21 = vld [vmem:[%s1151_s1 + $0x98] sm:$0xff]  ;;  %v888_v26 = vld [vmem:[%s1151_s1 + $0x10] sm:$0xff] }
  0x12   : > { %603 = vmatpush.bf16.msra.mxu2 %v908_v7  ;;  %177 = vst [vmem:[#allocation2 + $0x30] sm:$0xff] %v953_v4  ;;  %v906_v16 = vld [vmem:[%s1151_s1 + $0xa0] sm:$0xff]  ;;  %v913_v22 = vld [vmem:[%s1151_s1 + $0xd8] sm:$0xff]  ;;  %v896_v27 = vld [vmem:[%s1151_s1 + $0x50] sm:$0xff] }
  0x13   : > { %621 = vmatpush.bf16.msra.mxu3 %v916_v8  ;;  %178 = vst [vmem:[#allocation2 + $0x38] sm:$0xff] %v953_v4  ;;  %v914_v17 = vld [vmem:[%s1151_s1 + $0xe0] sm:$0xff]  ;;  %v200_v28 = vld [vmem:[%s1024_s16 + $0xa] sm:$0xff]  ;;  %v201_v39 = vld [vmem:[%s1024_s16 + $0x12] sm:$0xff] }
  0x14   : > { %179 = vst [vmem:[#allocation2 + $0x40] sm:$0xff] %v953_v4  ;;  %568 = vmatpush.bf16.msra.mxu0 %v891_v9  ;;  %v193_v23 = vld [vmem:[%s1024_s16 + $0x1] sm:$0xff]  ;;  %v904_v29 = vld [vmem:[%s1151_s1 + $0x90] sm:$0xff]  ;;  %v925_v54 = vld [vmem:[%s1151_s1 + $0x138] sm:$0xff] }
  0x15   : > { %586 = vmatpush.bf16.msra.mxu1 %v899_v10  ;;  %180 = vst [vmem:[#allocation2 + $0x48] sm:$0xff] %v953_v4  ;;  %v199_v25 = vld [vmem:[%s1024_s16 + $0x2] sm:$0xff]  ;;  %v912_v30 = vld [vmem:[%s1151_s1 + $0xd0] sm:$0xff] }
  0x16   : > { %604 = vmatpush.bf16.msra.mxu2 %v907_v11  ;;  %190 = vst.msk [vmem:[#allocation2] sm:$0xff] %vm189_vm0, %v186_v15  ;;  %v205_v31 = vld [vmem:[%s1024_s16 + $0x3] sm:$0xff]  ;;  %v206_v32 = vld [vmem:[%s1024_s16 + $0xb] sm:$0xff]  ;;  %v207_v42 = vld [vmem:[%s1024_s16 + $0x13] sm:$0xff] }
  0x17   : > { %622 = vmatpush.bf16.msra.mxu3 %v915_v12  ;;  %191 = vst.msk [vmem:[#allocation2 + $0x28] sm:$0xff] %vm189_vm0, %v187_v18  ;;  %v188_v33 = vld [vmem:[%s1024_s16 + $0x10] sm:$0xff]  ;;  %v887_v34 = vld [vmem:[%s1151_s1 + $0x8] sm:$0xff]  ;;  %v886_v40 = vld [vmem:[%s1151_s1] sm:$0xff] }
  0x18   : > { %181 = vst [vmem:[#allocation2 + $0x50] sm:$0xff] %v953_v4  ;;  %569 = vmatpush.bf16.msra.mxu0 %v890_v13  ;;  %v895_v35 = vld [vmem:[%s1151_s1 + $0x48] sm:$0xff]  ;;  %v195_v36 = vld [vmem:[%s1024_s16 + $0x11] sm:$0xff]  ;;  %v894_v41 = vld [vmem:[%s1151_s1 + $0x40] sm:$0xff] }
  0x19   : > { %587 = vmatpush.bf16.msra.mxu1 %v898_v14  ;;  %182 = vst [vmem:[#allocation2 + $0x58] sm:$0xff] %v953_v4  ;;  %v903_v37 = vld [vmem:[%s1151_s1 + $0x88] sm:$0xff]  ;;  %v902_v43 = vld [vmem:[%s1151_s1 + $0x80] sm:$0xff]  ;;  %v213_v52 = vld [vmem:[%s1024_s16 + $0x14] sm:$0xff] }
  0x1a   : > { %605 = vmatpush.bf16.msra.mxu2 %v906_v16  ;;  %183 = vst [vmem:[#allocation2 + $0x60] sm:$0xff] %v953_v4  ;;  %v911_v38 = vld [vmem:[%s1151_s1 + $0xc8] sm:$0xff]  ;;  %v910_v50 = vld [vmem:[%s1151_s1 + $0xc0] sm:$0xff]  ;;  %v924_v61 = vld [vmem:[%s1151_s1 + $0x130] sm:$0xff] }
  0x1b   : > { %623 = vmatpush.bf16.msra.mxu3 %v914_v17  ;;  %184 = vst [vmem:[#allocation2 + $0x68] sm:$0xff] %v953_v4  ;;  %v211_v46 = vld [vmem:[%s1024_s16 + $0x4] sm:$0xff]  ;;  %v212_v49 = vld [vmem:[%s1024_s16 + $0xc] sm:$0xff] }
  0x1c   : > { %185 = vst [vmem:[#allocation2 + $0x70] sm:$0xff] %v953_v4  ;;  %570 = vmatpush.bf16.msra.mxu0 %v889_v19  ;;  %v923_v62 = vld [vmem:[%s1151_s1 + $0x128] sm:$0xff]  ;;  %v922_v63 = vld [vmem:[%s1151_s1 + $0x120] sm:$0xff]  ;;  %v921_v4 = vld [vmem:[%s1151_s1 + $0x118] sm:$0xff] }
  0x1d   : > { %588 = vmatpush.bf16.msra.mxu1 %v897_v20  ;;  %196 = vst.msk [vmem:[#allocation2 + $0x8] sm:$0xff] %vm189_vm0, %v193_v23  ;;  %v217_v44 = vld [vmem:[#allocation2] sm:$0xff]  ;;  %v920_v9 = vld [vmem:[%s1151_s1 + $0x110] sm:$0xff]  ;;  %v919_v10 = vld [vmem:[%s1151_s1 + $0x108] sm:$0xff] }
  0x1e   : > { %606 = vmatpush.bf16.msra.mxu2 %v905_v21  ;;  %197 = vst.msk [vmem:[#allocation2 + $0x30] sm:$0xff] %vm189_vm0, %v194_v24  ;;  %v222_v45 = vld [vmem:[#allocation2 + $0x28] sm:$0xff]  ;;  %v918_v11 = vld [vmem:[%s1151_s1 + $0x100] sm:$0xff] }
  0x1f   : > { %624 = vmatpush.bf16.msra.mxu3 %v913_v22  ;;  %202 = vst.msk [vmem:[#allocation2 + $0x10] sm:$0xff] %vm189_vm0, %v199_v25  ;;  %v232_v55 = vpack.c.bf16 %v222_v45, %v217_v44 }
  0x20   : > { %203 = vst.msk [vmem:[#allocation2 + $0x38] sm:$0xff] %vm189_vm0, %v200_v28  ;;  %571 = vmatpush.bf16.msra.mxu0 %v888_v26 }
  0x21   : > { %589 = vmatpush.bf16.msra.mxu1 %v896_v27  ;;  %208 = vst.msk [vmem:[#allocation2 + $0x18] sm:$0xff] %vm189_vm0, %v205_v31  ;;  %v944_v27 = vld [vmem:[%s1152_s2] ss:$0 sm:$0xff] }
  0x22   : > { %607 = vmatpush.bf16.msra.mxu2 %v904_v29  ;;  %209 = vst.msk [vmem:[#allocation2 + $0x40] sm:$0xff] %vm189_vm0, %v206_v32 }
  0x23   : > { %625 = vmatpush.bf16.msra.mxu3 %v912_v30  ;;  %192 = vst.msk [vmem:[#allocation2 + $0x50] sm:$0xff] %vm189_vm0, %v188_v33 }
  0x24   : > { %198 = vst.msk [vmem:[#allocation2 + $0x58] sm:$0xff] %vm189_vm0, %v195_v36  ;;  %572 = vmatpush.bf16.msra.mxu0 %v887_v34  ;;  %v218_v47 = vld [vmem:[#allocation2 + $0x8] sm:$0xff] }
  0x25   : > { %590 = vmatpush.bf16.msra.mxu1 %v895_v35  ;;  %v223_v48 = vld [vmem:[#allocation2 + $0x30] sm:$0xff]  ;;  %204 = vst.msk [vmem:[#allocation2 + $0x60] sm:$0xff] %vm189_vm0, %v201_v39 }
  0x26   : > { %608 = vmatpush.bf16.msra.mxu2 %v903_v37  ;;  %v219_v51 = vld [vmem:[#allocation2 + $0x10] sm:$0xff]  ;;  %210 = vst.msk [vmem:[#allocation2 + $0x68] sm:$0xff] %vm189_vm0, %v207_v42  ;;  %v233_v56 = vpack.c.bf16 %v223_v48, %v218_v47 }
  0x27   : > { %626 = vmatpush.bf16.msra.mxu3 %v911_v38  ;;  %v224_v53 = vld [vmem:[#allocation2 + $0x38] sm:$0xff]  ;;  %214 = vst.msk [vmem:[#allocation2 + $0x20] sm:$0xff] %vm189_vm0, %v211_v46 }
  0x28   : > { %v220_v57 = vld [vmem:[#allocation2 + $0x18] sm:$0xff]  ;;  %215 = vst.msk [vmem:[#allocation2 + $0x48] sm:$0xff] %vm189_vm0, %v212_v49  ;;  %573 = vmatpush.bf16.msra.mxu0 %v886_v40  ;;  %v234_v58 = vpack.c.bf16 %v224_v53, %v219_v51 }
  0x29   : > { %591 = vmatpush.bf16.msra.mxu1 %v894_v41  ;;  %v225_v59 = vld [vmem:[#allocation2 + $0x40] sm:$0xff]  ;;  %216 = vst.msk [vmem:[#allocation2 + $0x70] sm:$0xff] %vm189_vm0, %v213_v52 }
  0x2a   : > { %609 = vmatpush.bf16.msra.mxu2 %v902_v43  ;;  %v235_v60 = vpack.c.bf16 %v225_v59, %v220_v57  ;;  %v227_v0 = vld [vmem:[#allocation2 + $0x50] sm:$0xff] }
  0x2b   : > { %627 = vmatpush.bf16.msra.mxu3 %v910_v50  ;;  %574 = vmatmul.bf16.vlgmr.msra.gmra.mxu0 %v232_v55  ;;  %v228_v1 = vld [vmem:[#allocation2 + $0x58] sm:$0xff]  ;;  %v237_v5 = vpack.c.bf16 %v227_v0, %v227_v0 }
  0x2c   : > { %638 = vmatpush.bf16.msrb.mxu0 %v925_v54  ;;  %592 = vmatmul.bf16.vlgmr.msra.gmra.mxu1 %v233_v56  ;;  %v229_v2 = vld [vmem:[#allocation2 + $0x60] sm:$0xff]  ;;  %v238_v6 = vpack.c.bf16 %v228_v1, %v228_v1 }
  0x2d   : > { %926 = vmatpush.bf16.msrb.mxu1 %v925_v54  ;;  %610 = vmatmul.bf16.vlgmr.msra.gmra.mxu2 %v234_v58  ;;  %v230_v3 = vld [vmem:[#allocation2 + $0x68] sm:$0xff]  ;;  %v239_v7 = vpack.c.bf16 %v229_v2, %v229_v2 }
  0x2e   : > { %628 = vmatmul.bf16.vlgmr.msra.gmra.mxu3 %v235_v60  ;;  %v240_v8 = vpack.c.bf16 %v230_v3, %v230_v3  ;;  %v221_v12 = vld [vmem:[#allocation2 + $0x20] sm:$0xff] }
  0x2f   : > { %v226_v13 = vld [vmem:[#allocation2 + $0x48] sm:$0xff] }
  0x30   : > { %639 = vmatpush.bf16.msrb.mxu0 %v924_v61  ;;  %v231_v14 = vld [vmem:[#allocation2 + $0x70] sm:$0xff]  ;;  %v236_v15 = vpack.c.bf16 %v226_v13, %v221_v12 }
  0x31   : > { %927 = vmatpush.bf16.msrb.mxu1 %v924_v61  ;;  %v241_v16 = vpack.c.bf16 %v231_v14, %v231_v14 }
  0x34   : > { %640 = vmatpush.bf16.msrb.mxu0 %v923_v62 }
  0x35   : > { %928 = vmatpush.bf16.msrb.mxu1 %v923_v62 }
  0x38   : > { %641 = vmatpush.bf16.msrb.mxu0 %v922_v63 }
  0x39   : > { %929 = vmatpush.bf16.msrb.mxu1 %v922_v63 }
  0x3b   : > { %579 = vmatmul.bf16.gmra.mxu0 %v237_v5 }
  0x3c   : > { %642 = vmatpush.bf16.msrb.mxu0 %v921_v4  ;;  %597 = vmatmul.bf16.gmra.mxu1 %v238_v6 }
  0x3d   : > { %930 = vmatpush.bf16.msrb.mxu1 %v921_v4  ;;  %615 = vmatmul.bf16.gmra.mxu2 %v239_v7 }
  0x3e   : > { %633 = vmatmul.bf16.gmra.mxu3 %v240_v8 }
  0x40   : > { %643 = vmatpush.bf16.msrb.mxu0 %v920_v9 }
  0x41   : > { %931 = vmatpush.bf16.msrb.mxu1 %v920_v9 }
  0x44   : > { %644 = vmatpush.bf16.msrb.mxu0 %v919_v10 }
  0x45   : > { %932 = vmatpush.bf16.msrb.mxu1 %v919_v10 }
  0x48   : > { %645 = vmatpush.bf16.msrb.mxu0 %v918_v11 }
  0x49   : > { %933 = vmatpush.bf16.msrb.mxu1 %v918_v11 }
  0x4b   : > { %646 = vmatmul.bf16.vlgmr.msrb.gmra.mxu0 %v236_v15 }
  0x4c   : > { %651 = vmatmul.bf16.vlgmr.msrb.gmra.mxu1 %v241_v16 }
  0xa8   : > { %v575_v17 = vpop.f32.mrf.mxu0 }
  0xa9   : > { %v593_v18 = vpop.f32.mrf.mxu1  ;;  %v576_v28 = vadd.f32 %v944_v27, %v575_v17 }
  0xab   : > { %v594_v34 = vadd.f32 %v593_v18, %v576_v28 }
  0xb0   : > { %v611_v19 = vpop.f32.mrf.mxu2  ;;  %v577_v21 = vpop.f32.mrf.mxu0 }
  0xb1   : > { %v629_v20 = vpop.f32.mrf.mxu3  ;;  %v595_v22 = vpop.f32.mrf.mxu1  ;;  %v612_v36 = vadd.f32 %v611_v19, %v594_v34  ;;  %v578_v38 = vadd.f32 %v944_v27, %v577_v21 }
  0xb3   : > { %v630_v39 = vadd.f32 %v629_v20, %v612_v36  ;;  %v596_v45 = vadd.f32 %v595_v22, %v578_v38 }
  0xb8   : > { %v613_v23 = vpop.f32.mrf.mxu2  ;;  %v580_v25 = vpop.f32.mrf.mxu0 }
  0xb9   : > { %v631_v24 = vpop.f32.mrf.mxu3  ;;  %v598_v26 = vpop.f32.mrf.mxu1  ;;  %v581_v29 = vadd.f32 %v944_v27, %v580_v25  ;;  %v614_v48 = vadd.f32 %v613_v23, %v596_v45 }
  0xbb   : > { %v599_v35 = vadd.f32 %v598_v26, %v581_v29  ;;  %v632_v49 = vadd.f32 %v631_v24, %v614_v48 }
  0xc0   : > { %v616_v30 = vpop.f32.mrf.mxu2  ;;  %v582_v32 = vpop.f32.mrf.mxu0 }
  0xc1   : > { %v634_v31 = vpop.f32.mrf.mxu3  ;;  %v600_v33 = vpop.f32.mrf.mxu1  ;;  %v617_v37 = vadd.f32 %v616_v30, %v599_v35 }
  0xc3   : > { %v635_v40 = vadd.f32 %v634_v31, %v617_v37 }
  0xc8   : > { %v618_v41 = vpop.f32.mrf.mxu2  ;;  %v647_v43 = vpop.f32.mrf.mxu0 }
  0xc9   : > { %v636_v42 = vpop.f32.mrf.mxu3  ;;  %v652_v44 = vpop.f32.mrf.mxu1  ;;  %v648_v46 = vadd.f32 %v647_v43, %v630_v39 }
  0xca   : > { %v653_v47 = vadd.f32 %v652_v44, %v635_v40 }
  0xcb   : > { %657 = vst.msk [vmem:[%s170_s29] sm:$0xff] %vm656_vm1, %v648_v46 }
  0xcc   : > { %659 = vst.msk [vmem:[%s170_s29 + $0x10] sm:$0xff] %vm656_vm1, %v653_v47 }
  0xd0   : > { %v649_v50 = vpop.f32.mrf.mxu0 }
  0xd1   : > { %v654_v51 = vpop.f32.mrf.mxu1  ;;  %v650_v52 = vadd.f32 %v649_v50, %v632_v49 }
  0xd3   : > { %658 = vst.msk [vmem:[%s170_s29 + $0x8] sm:$0xff] %vm656_vm1, %v650_v52 }
  0xd4 PF: > { %s13_s12 = sadd.s32 1, %s951_s12  }
  0xd5   : > { %p10_p4 = scmp.ge.s32.totalorder %s13_s12, 4  }
  0xd7   :  { %12 = sbr.rel (!%p10_p4) target bundleno = 1 (0x1), region = 62 }

</bundles_post_ra>
